<compile_context>
chip_gen: v6e
topology: v6e:2x2x1
jax: 0.10.0
libtpu: 0.0.40
codegen_flags: <defaults>
</compile_context>

<pallas_src>
import math
import functools

import jax
import jax.numpy as jnp
from jax.experimental import pallas as pl
from jax.experimental.pallas import tpu as pltpu


def _make_divisible(v, divisor, min_value=None):
    if min_value is None:
        min_value = divisor
    new_v = max(min_value, int(v + divisor / 2) // divisor * divisor)
    if new_v < 0.9 * v:
        new_v += divisor
    return new_v


# ---------------------------------------------------------------------------
# Kernel
# ---------------------------------------------------------------------------
def _se_kernel(x_ref, w1t_ref, b1_ref, w2t_ref, b2_ref, o_ref, *, inv_hw):
    """One batch-block of SqueezeExcite.

    x_ref : (B_blk, C, HW_pad) native dtype (padded lanes are zero)
    w1t_ref: (C, Cr) f32    b1_ref: (1, Cr) f32
    w2t_ref: (Cr, C) f32    b2_ref: (1, C) f32
    o_ref : (B_blk, C, HW_pad) native dtype
    """
    x = x_ref[...]

    # AdaptiveAvgPool2d(1): padded lanes are zero, so a plain lane-axis sum
    # divided by the true H*W is exact.  Accumulate in f32 even for bf16 x.
    pooled = jnp.sum(x.astype(jnp.float32), axis=-1) * inv_hw        # (B_blk, C)

    # conv_reduce (1x1 conv == channel matmul) + bias, then ReLU.
    r = jnp.dot(pooled, w1t_ref[...], preferred_element_type=jnp.float32)
    r = jnp.maximum(r + b1_ref[...], 0.0)                            # (B_blk, Cr)

    # conv_expand (1x1 conv) + bias.
    e = jnp.dot(r, w2t_ref[...], preferred_element_type=jnp.float32)
    e = e + b2_ref[...]                                              # (B_blk, C)

    # hard_sigmoid gate: relu6(e + 3) / 6, then scale the input tile.
    gate = jnp.clip(e + 3.0, 0.0, 6.0) * (1.0 / 6.0)
    o_ref[...] = (x * gate.astype(x.dtype)[:, :, None]).astype(o_ref.dtype)


# ---------------------------------------------------------------------------
# Wrapper
# ---------------------------------------------------------------------------
_TILE_BUDGET_BYTES = 24 * 1024 * 1024   # 2 pipeline buffers x (in + out) tiles
_VMEM_LIMIT_BYTES = 40 * 1024 * 1024    # above 16/32 MiB scoped defaults,
                                        # safely below v7x's 64 MiB physical


def _pick_batch_block(B, C, HW_pad, itemsize):
    """Largest batch block (dividing B) whose double-buffered in+out tiles fit
    the VMEM budget; prefers >= 2 grid steps so DMA and compute overlap."""
    divisors = [d for d in range(1, B + 1) if B % d == 0]
    fits = [d for d in divisors
            if 4 * d * C * HW_pad * itemsize <= _TILE_BUDGET_BYTES]
    if not fits:
        return 1
    pipelined = [d for d in fits if B // d >= 2]
    return max(pipelined) if pipelined else max(fits)


def squeeze_excite(x_nchw, w_reduce, b_reduce, w_expand, b_expand):
    """x_nchw: (B, C, H, W); w_reduce: (Cr, C); w_expand: (C, Cr)."""
    B, C, H, W = x_nchw.shape
    Cr = w_reduce.shape[0]
    HW = H * W
    HW_pad = ((HW + 127) // 128) * 128          # lane-dense stores

    dtype = x_nchw.dtype
    x_flat = x_nchw.reshape(B, C, HW)           # native dtype, no wrapper cast
    if HW_pad != HW:
        x_flat = jnp.pad(x_flat, ((0, 0), (0, 0), (0, HW_pad - HW)))

    # Tiny operands: keep the channel math in f32, pre-transpose in wrapper.
    w1t = jnp.transpose(w_reduce).astype(jnp.float32)       # (C, Cr)
    w2t = jnp.transpose(w_expand).astype(jnp.float32)       # (Cr, C)
    b1 = b_reduce.reshape(1, Cr).astype(jnp.float32)
    b2 = b_expand.reshape(1, C).astype(jnp.float32)

    b_blk = _pick_batch_block(B, C, HW_pad, dtype.itemsize)
    grid = (B // b_blk,)

    kernel = functools.partial(_se_kernel, inv_hw=1.0 / float(HW))

    out_flat = pl.pallas_call(
        kernel,
        out_shape=jax.ShapeDtypeStruct((B, C, HW_pad), dtype),
        grid_spec=pltpu.PrefetchScalarGridSpec(
            num_scalar_prefetch=0,
            grid=grid,
            in_specs=[
                pl.BlockSpec((b_blk, C, HW_pad), lambda i: (i, 0, 0)),
                pl.BlockSpec((C, Cr), lambda i: (0, 0)),   # resident weights
                pl.BlockSpec((1, Cr), lambda i: (0, 0)),
                pl.BlockSpec((Cr, C), lambda i: (0, 0)),
                pl.BlockSpec((1, C), lambda i: (0, 0)),
            ],
            out_specs=pl.BlockSpec((b_blk, C, HW_pad), lambda i: (i, 0, 0)),
        ),
        compiler_params=pltpu.CompilerParams(
            dimension_semantics=("parallel",),
            vmem_limit_bytes=_VMEM_LIMIT_BYTES,
        ),
    )(x_flat, w1t, b1, w2t, b2)

    if HW_pad != HW:
        out_flat = out_flat[:, :, :HW]
    return out_flat.reshape(B, C, H, W)


# ---------------------------------------------------------------------------
# Reference + demo
# ---------------------------------------------------------------------------
def _reference(x, w1, b1, w2, b2):
    pooled = jnp.mean(x.astype(jnp.float32), axis=(2, 3))    # (B, C)
    r = jnp.maximum(pooled @ w1.T + b1, 0.0)                 # (B, Cr)
    e = r @ w2.T + b2                                        # (B, C)
    gate = jnp.clip(e + 3.0, 0.0, 6.0) / 6.0
    return x * gate.astype(x.dtype)[:, :, None, None]


if __name__ == "__main__":
    # Module config: in_chs=8, se_ratio=0.25, divisor=4 -> reduced_chs=4
    in_chs = 8
    se_ratio = 0.25
    divisor = 4
    reduced_chs = _make_divisible(in_chs * se_ratio, divisor)

    B, H, W = 2, 16, 16

    key = jax.random.PRNGKey(0)
    kx, kw1, kb1, kw2, kb2 = jax.random.split(key, 5)

    x = jax.random.normal(kx, (B, in_chs, H, W), dtype=jnp.float32)

    # Deterministic parameter init (PyTorch Conv2d default: U(-bound, bound))
    bound1 = 1.0 / math.sqrt(in_chs)
    w_reduce = jax.random.uniform(kw1, (reduced_chs, in_chs), jnp.float32,
                                  -bound1, bound1)
    b_reduce = jax.random.uniform(kb1, (reduced_chs,), jnp.float32,
                                  -bound1, bound1)
    bound2 = 1.0 / math.sqrt(reduced_chs)
    w_expand = jax.random.uniform(kw2, (in_chs, reduced_chs), jnp.float32,
                                  -bound2, bound2)
    b_expand = jax.random.uniform(kb2, (in_chs,), jnp.float32,
                                  -bound2, bound2)

    out = squeeze_excite(x, w_reduce, b_reduce, w_expand, b_expand)
    out = jax.block_until_ready(out)

    ref = _reference(x, w_reduce, b_reduce, w_expand, b_expand)
    assert out.shape == (B, in_chs, H, W)
    assert jnp.allclose(out, ref, atol=1e-5, rtol=1e-5), "mismatch vs reference"

    print("KERNEL_OK")
</pallas_src>

<mosaic_0001>
module attributes {stable_mosaic.version = 11 : i64} {
  func.func @_se_kernel(%arg0: i32, %arg1: memref<1x8x256xf32, #tpu.memory_space<vmem>>, %arg2: memref<8x4xf32, #tpu.memory_space<vmem>>, %arg3: memref<1x4xf32, #tpu.memory_space<vmem>>, %arg4: memref<4x8xf32, #tpu.memory_space<vmem>>, %arg5: memref<1x8xf32, #tpu.memory_space<vmem>>, %arg6: memref<1x8x256xf32, #tpu.memory_space<vmem>>) attributes {dimension_semantics = [#tpu.dimension_semantics<parallel>], iteration_bounds = array<i64: 2>, scalar_prefetch = 0 : i64, scratch_operands = 0 : i64, tpu.core_type = #tpu.core_type<tc>, window_params = [{transform_indices = @transform_0, window_bounds = array<i64: 1, 8, 256>}, {pipeline_mode = #tpu.pipeline_mode<synchronous>, transform_indices = @transform_1, window_bounds = array<i64: 8, 4>}, {pipeline_mode = #tpu.pipeline_mode<synchronous>, transform_indices = @transform_2, window_bounds = array<i64: 1, 4>}, {pipeline_mode = #tpu.pipeline_mode<synchronous>, transform_indices = @transform_3, window_bounds = array<i64: 4, 8>}, {pipeline_mode = #tpu.pipeline_mode<synchronous>, transform_indices = @transform_4, window_bounds = array<i64: 1, 8>}, {transform_indices = @transform_5, window_bounds = array<i64: 1, 8, 256>}]} {
    %c0 = arith.constant 0 : index
    %c0_0 = arith.constant 0 : index
    %c0_1 = arith.constant 0 : index
    %0 = vector.load %arg1[%c0, %c0_0, %c0_1] : memref<1x8x256xf32, #tpu.memory_space<vmem>>, vector<1x8x256xf32>
    %cst = arith.constant dense<0.000000e+00> : vector<1x8xf32>
    %1 = vector.multi_reduction <add>, %0, %cst [2] : vector<1x8x256xf32> to vector<1x8xf32>
    %cst_2 = arith.constant 3.906250e-03 : f32
    %2 = vector.broadcast %cst_2 : f32 to vector<1x8xf32>
    %3 = arith.mulf %1, %2 : vector<1x8xf32>
    %c0_3 = arith.constant 0 : index
    %c0_4 = arith.constant 0 : index
    %4 = vector.load %arg2[%c0_3, %c0_4] : memref<8x4xf32, #tpu.memory_space<vmem>>, vector<8x4xf32>
    %cst_5 = arith.constant dense<0.000000e+00> : vector<1x4xf32>
    %5 = tpu.matmul %3, %4, %cst_5 {dimension_numbers = #tpu.dot_dimension_numbers<[1], [0], [0], [1], [0, 0, 1, 1], [], []>} : vector<1x8xf32>, vector<8x4xf32>, vector<1x4xf32> -> vector<1x4xf32>
    %c0_6 = arith.constant 0 : index
    %c0_7 = arith.constant 0 : index
    %6 = vector.load %arg3[%c0_6, %c0_7] : memref<1x4xf32, #tpu.memory_space<vmem>>, vector<1x4xf32>
    %7 = arith.addf %5, %6 : vector<1x4xf32>
    %cst_8 = arith.constant 0.000000e+00 : f32
    %8 = vector.broadcast %cst_8 : f32 to vector<1x4xf32>
    %9 = arith.maximumf %7, %8 : vector<1x4xf32>
    %c0_9 = arith.constant 0 : index
    %c0_10 = arith.constant 0 : index
    %10 = vector.load %arg4[%c0_9, %c0_10] : memref<4x8xf32, #tpu.memory_space<vmem>>, vector<4x8xf32>
    %cst_11 = arith.constant dense<0.000000e+00> : vector<1x8xf32>
    %11 = tpu.matmul %9, %10, %cst_11 {dimension_numbers = #tpu.dot_dimension_numbers<[1], [0], [0], [1], [0, 0, 1, 1], [], []>} : vector<1x4xf32>, vector<4x8xf32>, vector<1x8xf32> -> vector<1x8xf32>
    %c0_12 = arith.constant 0 : index
    %c0_13 = arith.constant 0 : index
    %12 = vector.load %arg5[%c0_12, %c0_13] : memref<1x8xf32, #tpu.memory_space<vmem>>, vector<1x8xf32>
    %13 = arith.addf %11, %12 : vector<1x8xf32>
    %cst_14 = arith.constant 3.000000e+00 : f32
    %14 = vector.broadcast %cst_14 : f32 to vector<1x8xf32>
    %15 = arith.addf %13, %14 : vector<1x8xf32>
    %cst_15 = arith.constant 0.000000e+00 : f32
    %cst_16 = arith.constant 6.000000e+00 : f32
    %16 = vector.broadcast %cst_15 : f32 to vector<1x8xf32>
    %17 = arith.maximumf %16, %15 : vector<1x8xf32>
    %18 = vector.broadcast %cst_16 : f32 to vector<1x8xf32>
    %19 = arith.minimumf %18, %17 : vector<1x8xf32>
    %cst_17 = arith.constant 0.166666672 : f32
    %20 = vector.broadcast %cst_17 : f32 to vector<1x8xf32>
    %21 = arith.mulf %19, %20 : vector<1x8xf32>
    %22 = vector.shape_cast %21 : vector<1x8xf32> to vector<1x8x1xf32>
    %23 = vector.broadcast %22 : vector<1x8x1xf32> to vector<1x8x256xf32>
    %24 = arith.mulf %0, %23 : vector<1x8x256xf32>
    %c0_18 = arith.constant 0 : index
    %c0_19 = arith.constant 0 : index
    %c0_20 = arith.constant 0 : index
    %25 = vector.load %arg6[%c0_18, %c0_19, %c0_20] : memref<1x8x256xf32, #tpu.memory_space<vmem>>, vector<1x8x256xf32>
    tpu.vector_store %arg6[%c0_18, %c0_19, %c0_20], %24 {strides = array<i32>} : memref<1x8x256xf32, #tpu.memory_space<vmem>>, vector<1x8x256xf32>,
    return
  }
  func.func @transform_0(%arg0: i32) -> (i32, i32, i32) {
    %c0_i32 = arith.constant 0 : i32
    %c0_i32_0 = arith.constant 0 : i32
    %c0_i32_1 = arith.constant 0 : i32
    return %arg0, %c0_i32, %c0_i32_0 : i32, i32, i32
  }
  func.func @transform_1(%arg0: i32) -> (i32, i32) {
    %c0_i32 = arith.constant 0 : i32
    %c0_i32_0 = arith.constant 0 : i32
    %c0_i32_1 = arith.constant 0 : i32
    return %c0_i32, %c0_i32_0 : i32, i32
  }
  func.func @transform_2(%arg0: i32) -> (i32, i32) {
    %c0_i32 = arith.constant 0 : i32
    %c0_i32_0 = arith.constant 0 : i32
    %c0_i32_1 = arith.constant 0 : i32
    return %c0_i32, %c0_i32_0 : i32, i32
  }
  func.func @transform_3(%arg0: i32) -> (i32, i32) {
    %c0_i32 = arith.constant 0 : i32
    %c0_i32_0 = arith.constant 0 : i32
    %c0_i32_1 = arith.constant 0 : i32
    return %c0_i32, %c0_i32_0 : i32, i32
  }
  func.func @transform_4(%arg0: i32) -> (i32, i32) {
    %c0_i32 = arith.constant 0 : i32
    %c0_i32_0 = arith.constant 0 : i32
    %c0_i32_1 = arith.constant 0 : i32
    return %c0_i32, %c0_i32_0 : i32, i32
  }
  func.func @transform_5(%arg0: i32) -> (i32, i32, i32) {
    %c0_i32 = arith.constant 0 : i32
    %c0_i32_0 = arith.constant 0 : i32
    %c0_i32_1 = arith.constant 0 : i32
    return %arg0, %c0_i32, %c0_i32_0 : i32, i32, i32
  }
}

</mosaic_0001>

<bundles_post_ra>
// kernel: tpu_custom_call.1
= control target key start
LH: loop header
LB: loop body
LE: loop exit
PB: predicated region body
PF: predicated region fallthrough
CT: control target
= control target key end

     0   :  { %10 = vsyncpa [#allocation3], 0  ;;  %s882_s0 = inlined_call_operand.hbm [shape: f32[2,8,256], index: 0, kind: input, shape index: {}]   ;;  %s883_s1 = inlined_call_operand.vmem [shape: f32[8,4], index: 1, kind: input, shape index: {}]   ;;  %s884_s2 = inlined_call_operand.vmem [shape: f32[1,4], index: 2, kind: input, shape index: {}]   ;;  %s885_s3 = inlined_call_operand.vmem [shape: f32[4,8], index: 3, kind: input, shape index: {}]   ;;  %s886_s4 = inlined_call_operand.vmem [shape: f32[1,8], index: 4, kind: input, shape index: {}]   ;;  %s887_s5 = inlined_call_operand.hbm [shape: f32[2,8,256], index: 5, kind: output, shape index: {}]  }
   0x1   :  { %12 = vsyncpa [#allocation3 + $0x1], 0 }
   0x2   :  { %13 = vsyncpa [#allocation4], 0 }
   0x3   :  { %15 = vsyncpa [#allocation4 + $0x1], 0  ;;  %s719_s18 = smov 0   ;;  %s721_s19 = smov 0  }
   0x4   :  { %s723_s20 = smov 0   ;;  %s725_s21 = smov 0  }
   0x5 LB: > { %s740_s22 = sadd.s32 4294967295, %s683_s21   ;;  %s510_s23 = sadd.s32 4294967294, %s683_s21   ;;  %s683_s21 = sphi %s725_s21, %s904_s21   ;;  %s679_s20 = sphi %s723_s20, %s903_s20   ;;  %s675_s19 = sphi %s721_s19, %s902_s19   ;;  %s671_s18 = sphi %s719_s18, %s901_s18  }
   0x6   : > { %s744_s24 = sadd.s32 1, %s683_s21   ;;  %s28_s25 = sadd.s32 1, %s679_s20 }
   0x7   : > { %s25_s26 = ssub.s32 %s683_s21, %s744_s24  ;;  %p35_p0 = scmp.ne.s32.totalorder %s679_s20, %s675_s19 }
   0x8   : > { %p26_p1 = scmp.eq.s32.totalorder %s25_s26, 0  ;;  %p36_p2 = scmp.eq.s32.totalorder %s683_s21, 0 }
   0x9   : > { %p41_p3 = scmp.ne.s32.totalorder %s675_s19, %s671_s18  ;;  %p42_p4 = scmp.eq.s32.totalorder %s740_s22, 0 }
   0xa   : > { %s756_s27 = scalar_select %p26_p1, %s679_s20, %s28_s25  }
   0xb   : > { %p758_p5 = por %p36_p2, %p35_p0  ;;  %p762_p6 = por %p42_p4, %p41_p3 }
   0xc   : > { %p149_p7 = scmp.eq.s32.totalorder %s740_s22, 1  ;;  %p155_p8 = scmp.eq.s32.totalorder %s510_s23, 1 }
   0xd   : > { %s891_s29 = scalar_select %p762_p6, 1, 0 }
   0xe   : > { %p555_p10 = scmp.lt.s32.totalorder %s683_s21, 2  ;;  %p769_p11 = por %p149_p7, %p35_p0 }
   0xf   : > { %p773_p12 = por %p155_p8, %p41_p3  ;;  %s187_s7 = sand.u32 1, %s679_s20  }
  0x10   : > { %s892_s30 = scalar_select %p769_p11, 1, 0 }
  0x11   : > { %s893_s6 = scalar_select %p773_p12, 1, 0 }
  0x12   : > { %s527_s8 = sshll.u32 %s683_s21, 8  ;;  %s513_s9 = sshll.u32 %s187_s7, 4 }
  0x13   : > { %s782_s12 = scalar_lea.hbm %s882_s0, %s527_s8  ;;  %s191_s13 = scalar_lea.vmem [#allocation2], %s513_s9 }
  0x14   : > { %s199_s14 = sshll.u32 %s191_s13, 4  ;;  %p786_p13 = pnand %p555_p10, %p758_p5  ;;  %s790_s14 = int_to_ptr.vmem [resolvable:$true] %s199_s14 }
  0x15   : > { %s188_s16 = scalar_lea.sflag [#allocation3], %s187_s7  ;;  %s591_s17 = scalar_lea.hbm %s782_s12, 256 }
  0x16   : > { %p592_p2 = scmp.ne.s32.totalorder %s782_s12, %s591_s17  ;;  %p593_p3 = pneg %p786_p13 }
  0x17   : > { %s596_s26 = scalar_lea.hbm %s882_s0, 512  ;;  %p597_p5 = scmp.lt.s32.totalorder %s782_s12, %s882_s0 }
  0x18   : > { %p594_p4 = pnand %p593_p3, %p592_p2  ;;  %p598_p8 = scmp.lt.s32.totalorder %s596_s26, %s591_s17 }
  0x1a   : > { %p595_p7 = pneg %p594_p4  ;;  %p599_p10 = por %p598_p8, %p597_p5 }
  0x1c   : > { %p600_p9 = pnand %p599_p10, %p595_p7 }
  0x1e   : > { %603 = shalt.err (!%p600_p9)
}
  0x1f   : > { %s604_s7 = scalar_lea.vmem %s790_s14, 256  ;;  %s685_s9 = smov [#allocation2]  }
  0x20   : > { %p605_p0 = scmp.ne.s32.totalorder %s790_s14, %s604_s7  ;;  %s609_s10 = sshll.u32 %s685_s9, 4  ;;  %s610_s10 = int_to_ptr.vmem [resolvable:$false] %s609_s10 }
  0x21   : > { %s611_s11 = scalar_lea.vmem %s610_s10, 512  ;;  %p612_p4 = scmp.lt.s32.totalorder %s790_s14, %s610_s10 }
  0x22   : > { %p607_p1 = pnand %p605_p0, %p593_p3  ;;  %p613_p12 = scmp.lt.s32.totalorder %s611_s11, %s604_s7 }
  0x24   : > { %p608_p2 = pneg %p607_p1  ;;  %p614_p11 = por %p613_p12, %p612_p4 }
  0x26   : > { %p615_p6 = pnand %p614_p11, %p608_p2 }
  0x28   : > { %618 = shalt.err (!%p615_p6)
}
  0x29   : > { %550 = dma.hbm_to_vmem [thread:$0]  (!%p786_p13), %s782_s12, 256, %s790_s14, %s188_s16  }
  0x2a   : > { %p895_p9 = scmp.lt.s32.totalorder %s683_s21, 3  ;;  %p896_p7 = scmp.ge.s32.totalorder %s683_s21, 1 }
  0x2c   : > { %p205_p0 = pnand %p896_p7, %p895_p9 }
  0x2d   : > { %s817_s13 = sand.u32 (!%p205_p0), 1, %s675_s19   ;;  %p897_p6 = scmp.ne.s32.totalorder (!%p205_p0), %s891_s29, 0 }
  0x2e   : > { %208 = sbr.rel (%p205_p0) target bundleno = 729 (0x2d9), region = 40  ;;  %s517_s17 = sshll.u32 (!%p205_p0), %s817_s13, 4 }
  0x2f   : > { %s211_s23 = scalar_lea.sflag (!%p205_p0), [#allocation3], %s817_s13  ;;  %s214_s15 = scalar_lea.vmem (!%p205_p0), [#allocation2], %s517_s17 }
  0x33   : > { %662 = dma.done.wait (%p897_p6), %s211_s23, 256  }
  0x34   : > { %664 = vsyncadd (%p897_p6), %s211_s23, 4294967040  ;;  %v241_v0 = vld [vmem:[%s214_s15] sm:$0xff]  ;;  %v242_v1 = vld [vmem:[%s214_s15 + $0x8] sm:$0xff]  ;;  %v686_v3 = vmov 0.0   ;;  %vm687_vm0 = vmmov 0   ;;  %v250_v5 = vlaneseq  ;;  %vm256_vm1 = vcmask 64512  }
  0x35   : > { %v243_v2 = vadd.f32 %v242_v1, %v241_v0  ;;  %533 = vmatprep.subr.mxu0 %v686_v3  ;;  %v247_v4 = vld [vmem:[%s883_s1] sm:$0xff]  ;;  %538 = vmatprep.subr.mxu1 %v686_v3  ;;  %vm336_vm2 = vcmask 1043456   ;;  %vm332_vm3 = vcmask 31744   ;;  %s528_s7 = sshll.u32 %s740_s22, 8  ;;  %s240_s9 = scalar_lea.vmem [#allocation5], %s517_s17 }
  0x36   : > { %534 = vmatpush3.msra.mxu0 %v247_v4  ;;  %535 = vmatprep.mubr.msk.f32.mxu0 %vm687_vm0, %v686_v3  ;;  %v251_v6 = vand.u32 127, %v250_v5  ;;  %v253_v7 = vshrl.u32 %v250_v5, 7  ;;  %v330_v12 = vld [vmem:[%s885_s3] sm:$0xf]  ;;  %s440_s10 = sshll.u32 %s240_s9, 4  ;;  %s845_s15 = scalar_lea.hbm %s887_s5, %s528_s7  ;;  %s441_s10 = int_to_ptr.vmem [resolvable:$true] %s440_s10 }
  0x37   : > { %244 = vadd.xlane.f32.xlu0 %v243_v2  ;;  %540 = vmatprep.mubr.msk.f32.mxu1 %vm687_vm0, %v686_v3  ;;  %v248_v13 = vld [vmem:[%s884_s2] sm:$0x1]  ;;  %s426_s12 = scalar_lea.sflag [#allocation4], %s817_s13  ;;  %s619_s14 = scalar_lea.vmem %s441_s10, 256 }
  0x38   : > { %v254_v8 = vsub.s32 %v251_v6, %v253_v7  ;;  %539 = vmatpush3.msk.msra.mxu1 %vm336_vm2, %v330_v12  ;;  %v331_v18 = vld [vmem:[%s886_s4] sm:$0x1]  ;;  %v416_v25 = vsub.s32 0, %v253_v7  ;;  %p620_p11 = scmp.ne.s32.totalorder %s441_s10, %s619_s14  ;;  %p898_p12 = scmp.ne.s32.totalorder %s892_s30, 0 }
  0x39   : > { %s688_s22 = smov [#allocation5]  }
  0x3a   : > { %p621_p13 = pnand %p620_p11, %p898_p12  ;;  %s623_s17 = sshll.u32 %s688_s22, 4  ;;  %s624_s17 = int_to_ptr.vmem [resolvable:$false] %s623_s17 }
  0x3b   : > { %s625_s29 = scalar_lea.vmem %s624_s17, 512  ;;  %p626_p3 = scmp.lt.s32.totalorder %s441_s10, %s624_s17 }
  0x3c   : > { %p622_p1 = pneg %p621_p13  ;;  %p627_p5 = scmp.lt.s32.totalorder %s625_s29, %s619_s14 }
  0x3e   : > { %p628_p8 = por %p627_p5, %p626_p3 }
  0x40   : > { %p629_p10 = pnand %p628_p8, %p622_p1 }
  0xc0   : > { %v245_v9 = vpop.xlane.xlu0 %244 }
  0xc1   : > { %v246_v10 = vmul.f32 0.00390625, %v245_v9 }
  0xc3   : > { %v255_v11 = vrot.slane %v246_v10, %v254_v8 }
  0xc5   : > { %536 = vmatmul.mubr.msk.f32.vlgmr.msra.gmra.mxu0 %vm256_vm1, %v255_v11 }
 0x185   : > { %v325_v14 = vpop.f32.mrf.mxu0 }
 0x186   : > { %v326_v15 = vadd.f32 %v325_v14, %v248_v13 }
 0x187   : > { %v537_v16 = vpop.f32.mrf.mxu0 }
 0x188   : > { %v329_v17 = vmax.f32 %v326_v15, 0.0 }
 0x18a   : > { %541 = vmatmul.mubr.msk.f32.vlgmr.msra.gmra.mxu1 %vm332_vm3, %v329_v17 }
 0x24a   : > { %v406_v19 = vpop.f32.mrf.mxu1 }
 0x24b   : > { %v407_v20 = vadd.f32 %v406_v19, %v331_v18 }
 0x24c   : > { %v542_v21 = vpop.f32.mrf.mxu1 }
 0x24d   : > { %v410_v22 = vadd.f32 3.0, %v407_v20 }
 0x24f   : > { %v411_v23 = vmax.f32 %v410_v22, 0.0 }
 0x251   : > { %v412_v24 = vmin.f32 %v411_v23, 6.0 }
 0x253   : > { %v413_v26 = vmul.f32 0.16666667, %v412_v24 }
 0x255   : > { %v417_v27 = vrot.slane %v413_v26, %v416_v25 }
 0x257   : > { %419 = vbcast.lane.b32.xlu0 %v417_v27, 256 }
 0x2c9   : > { %v420_v28 = vpop.permute.xlu0 %419 }
 0x2ca   : > { %v421_v29 = vmul.f32 %v420_v28, %v241_v0  ;;  %v422_v30 = vmul.f32 %v420_v28, %v242_v1 }
 0x2cc   : > { %423 = vst [vmem:[%s240_s9] sm:$0xff] %v421_v29  ;;  %424 = vst [vmem:[%s240_s9 + $0x8] sm:$0xff] %v422_v30 }
 0x2cd   : > { %632 = shalt.err (!%p629_p10)
}
 0x2ce   : > { %s633_s16 = scalar_lea.hbm %s845_s15, 256  ;;  %s637_s26 = scalar_lea.hbm %s887_s5, 512 }
 0x2cf   : > { %p634_p2 = scmp.ne.s32.totalorder %s845_s15, %s633_s16  ;;  %p638_p7 = scmp.lt.s32.totalorder %s845_s15, %s887_s5 }
 0x2d0   : > { %p639_p0 = scmp.lt.s32.totalorder %s637_s26, %s633_s16 }
 0x2d1   : > { %p635_p4 = pnand %p634_p2, %p898_p12 }
 0x2d2   : > { %p640_p6 = por %p639_p0, %p638_p7 }
 0x2d3   : > { %p636_p9 = pneg %p635_p4 }
 0x2d5   : > { %p641_p11 = pnand %p640_p6, %p636_p9 }
 0x2d7   : > { %644 = shalt.err (!%p641_p11)
}
 0x2d8   : > { %545 = dma.vmem_to_hbm [thread:$0]  (%p898_p12), %s441_s10, 256, %s845_s15, %s426_s12  }
 0x2d9 PF: > { %s452_s7 = sand.u32 1, %s671_s18   ;;  %p899_p13 = scmp.ne.s32.totalorder %s893_s6, 0 }
 0x2da   : > { %p900_p1 = scmp.ge.s32.totalorder %s683_s21, 2  ;;  %s453_s9 = scalar_lea.sflag [#allocation4], %s452_s7 }
 0x2dc   : > { %p552_p3 = pnand %p900_p1, %p899_p13 }
 0x2de   : > { %p553_p5 = pneg %p552_p3 }
 0x2e0   : > { %666 = dma.done.wait (%p553_p5), %s453_s9, 256  }
 0x2e1   : > { %668 = vsyncadd (%p553_p5), %s453_s9, 4294967040  ;;  %p18_p8 = scmp.ge.s32.totalorder %s744_s24, 4   ;;  %s901_s18 = smov %s675_s19 }
 0x2e2   : > { %s902_s19 = smov %s679_s20  ;;  %s903_s20 = smov %s756_s27 }
 0x2e3   : > { %s904_s21 = smov %s744_s24  ;;  %20 = sbr.rel (!%p18_p8) target bundleno = 5 (0x5), region = 85 }
 0x2e8   :  { %458 = vsyncpa [#allocation3], 1 }
 0x2e9   :  { %460 = vsyncpa [#allocation3 + $0x1], 1 }
 0x2ea   :  { %461 = vsyncpa [#allocation4], 1 }
 0x2eb   :  { %463 = vsyncpa [#allocation4 + $0x1], 1 }

</bundles_post_ra>
